<compile_context>
chip_gen: v7x
topology: tpu7x:2x2x1
jax: 0.10.0
libtpu: 0.0.40
codegen_flags: <defaults>
</compile_context>

<pallas_src>
import functools

import jax
import jax.numpy as jnp
import numpy as np
from jax.experimental import pallas as pl
from jax.experimental.pallas import tpu as pltpu


def _round_up(x, m):
    return ((x + m - 1) // m) * m


def _gaussian_smearing_kernel(dist_ref, offset_ref, out_ref, *, coeff, chunk):
    # dist_ref:   (1, TILE_N)   lane-dense block of distances
    # offset_ref: (G_PAD, 1)    gaussian centers on sublanes (constant block)
    # out_ref:    (TILE_N, G)   gaussian expansion of this block
    tile_n = dist_ref.shape[1]
    num_gaussians = out_ref.shape[1]

    centers = offset_ref[...]                          # (G_PAD, 1), hoisted

    # Static chunk loop: all ref slices are static, and per-chunk values stay
    # well inside the 64-vreg register file (no spills).  Compute is
    # lane-dense; the (G_PAD, CHUNK) result rides the otherwise-idle XLU for
    # the transpose just before the (unavoidably 50-lane) store.
    for col in range(0, tile_n, chunk):
        d = dist_ref[:, col:col + chunk]               # (1, CHUNK)
        diff = d - centers                             # (G_PAD, CHUNK)
        g = jnp.exp(coeff * (diff * diff))             # dense-lane EUP exp
        gt = jnp.transpose(g, (1, 0))                  # (CHUNK, G_PAD) via XLU
        out_ref[col:col + chunk, :] = gt[:, :num_gaussians]


def gaussian_smearing(dist, *, start=0.0, stop=5.0, num_gaussians=50,
                      tile_n=8192, chunk=256):
    """Pallas implementation of GaussianSmearing.forward.

    dist: any shape; flattened like torch's .view(-1, 1).
    Returns: (N, num_gaussians) float32, N = dist.size.
    """
    if num_gaussians < 2:
        raise ValueError("num_gaussians must be >= 2 (same limit as PyTorch).")

    # Exact float32 linspace centers (what torch.linspace registers as the
    # buffer) and coeff derived from the float32 step, as in the module.
    offset_np = np.linspace(start, stop, num_gaussians).astype(np.float32)
    coeff = -0.5 / float(offset_np[1] - offset_np[0]) ** 2

    # Centers padded to a multiple of 8 sublanes; padded rows are computed but
    # sliced off before the store.
    g_pad = _round_up(num_gaussians, 8)
    offset_pad = np.full((g_pad, 1), offset_np[-1], dtype=np.float32)
    offset_pad[:num_gaussians, 0] = offset_np
    offsets = jnp.asarray(offset_pad)

    # Lane-major distances: contiguous DMA, no 128x lane padding of the input.
    dist_flat = jnp.reshape(dist, (1, -1)).astype(jnp.float32)      # (1, N)
    n = dist_flat.shape[1]

    # Tile sizing: big tiles amortize per-grid-step overhead (the kernel is
    # HBM-write-bound), clamped for small inputs, and capped so large inputs
    # give >= 2 grid steps (v7x has two TensorCores on the "parallel" axis).
    chunk = max(128, _round_up(int(chunk), 128))
    tile_n = _round_up(max(int(tile_n), chunk), chunk)
    tile_n = min(tile_n, _round_up(n, chunk))
    if n >= 4 * chunk:
        tile_n = min(tile_n, _round_up(pl.cdiv(n, 2), chunk))
    tile_n = max(tile_n, chunk)
    grid = (pl.cdiv(n, tile_n),)

    kernel = functools.partial(_gaussian_smearing_kernel,
                               coeff=coeff, chunk=chunk)

    return pl.pallas_call(
        kernel,
        out_shape=jax.ShapeDtypeStruct((n, num_gaussians), jnp.float32),
        grid_spec=pltpu.PrefetchScalarGridSpec(
            num_scalar_prefetch=0,
            grid=grid,
            in_specs=[
                # Distances: lane-dense block, contiguous DMA.
                pl.BlockSpec((1, tile_n), lambda i: (0, i)),
                # Centers: tiny constant block, fetched once and resident.
                pl.BlockSpec((g_pad, 1), lambda i: (0, 0)),
            ],
            out_specs=pl.BlockSpec((tile_n, num_gaussians), lambda i: (i, 0)),
        ),
        compiler_params=pltpu.CompilerParams(
            dimension_semantics=("parallel",)),
    )(dist_flat, offsets)


def _reference(dist, start=0.0, stop=5.0, num_gaussians=50):
    # Pure-JAX mirror of the PyTorch module (same float32 linspace centers).
    offset_np = np.linspace(start, stop, num_gaussians).astype(np.float32)
    coeff = -0.5 / float(offset_np[1] - offset_np[0]) ** 2
    offset = jnp.asarray(offset_np)
    d = jnp.reshape(dist, (-1, 1)).astype(jnp.float32) - offset.reshape(1, -1)
    return jnp.exp(coeff * (d * d))


if __name__ == "__main__":
    key = jax.random.PRNGKey(0)
    k1, k2 = jax.random.split(key)

    # Case 1: 1-D distances, N not a multiple of the tile -> exercises the
    # masked overhanging rows/columns of the single block.
    d1 = jax.random.uniform(k1, (300,), jnp.float32, 0.0, 5.0)
    o1 = jax.block_until_ready(gaussian_smearing(d1))
    r1 = _reference(d1)
    assert o1.shape == (300, 50), o1.shape
    assert jnp.allclose(o1, r1, atol=1e-5, rtol=1e-5), \
        float(jnp.max(jnp.abs(o1 - r1)))

    # Case 2: multi-dim input (flattened like torch's .view(-1, 1)),
    # multi-step grid and multi-chunk inner loop.
    d2 = jax.random.uniform(k2, (4, 640), jnp.float32, 0.0, 5.0)
    o2 = jax.block_until_ready(gaussian_smearing(d2, tile_n=512))
    r2 = _reference(d2)
    assert o2.shape == (2560, 50), o2.shape
    assert jnp.allclose(o2, r2, atol=1e-5, rtol=1e-5), \
        float(jnp.max(jnp.abs(o2 - r2)))

    print("KERNEL_OK")
</pallas_src>

<mosaic_0001>
module attributes {stable_mosaic.version = 11 : i64} {
  func.func @_gaussian_smearing_kernel(%arg0: i32, %arg1: memref<1x512xf32, #tpu.memory_space<vmem>>, %arg2: memref<56x1xf32, #tpu.memory_space<vmem>>, %arg3: memref<512x50xf32, #tpu.memory_space<vmem>>) attributes {dimension_semantics = [#tpu.dimension_semantics<parallel>], iteration_bounds = array<i64: 1>, scalar_prefetch = 0 : i64, scratch_operands = 0 : i64, tpu.core_type = #tpu.core_type<tc>, window_params = [{transform_indices = @transform_0, window_bounds = array<i64: 1, 512>}, {pipeline_mode = #tpu.pipeline_mode<synchronous>, transform_indices = @transform_1, window_bounds = array<i64: 56, 1>}, {transform_indices = @transform_2, window_bounds = array<i64: 512, 50>}]} {
    %c0 = arith.constant 0 : index
    %c0_0 = arith.constant 0 : index
    %0 = vector.load %arg2[%c0, %c0_0] : memref<56x1xf32, #tpu.memory_space<vmem>>, vector<56x1xf32>
    %c0_1 = arith.constant 0 : index
    %c0_2 = arith.constant 0 : index
    %1 = vector.load %arg1[%c0_1, %c0_2] : memref<1x512xf32, #tpu.memory_space<vmem>>, vector<1x256xf32>
    %2 = vector.broadcast %1 : vector<1x256xf32> to vector<56x256xf32>
    %3 = vector.broadcast %0 : vector<56x1xf32> to vector<56x256xf32>
    %4 = arith.subf %2, %3 : vector<56x256xf32>
    %5 = arith.mulf %4, %4 : vector<56x256xf32>
    %cst = arith.constant -48.0199966 : f32
    %6 = vector.broadcast %cst : f32 to vector<56x256xf32>
    %7 = arith.mulf %6, %5 : vector<56x256xf32>
    %8 = math.exp %7 : vector<56x256xf32>
    %9 = tpu.transpose %8, [1, 0] : vector<56x256xf32> -> vector<256x56xf32>
    %10 = vector.extract_strided_slice %9 {offsets = [0, 0], sizes = [256, 50], strides = [1, 1]} : vector<256x56xf32> to vector<256x50xf32>
    %c0_3 = arith.constant 0 : index
    %c0_4 = arith.constant 0 : index
    %11 = vector.load %arg3[%c0_3, %c0_4] : memref<512x50xf32, #tpu.memory_space<vmem>>, vector<256x50xf32>
    tpu.vector_store %arg3[%c0_3, %c0_4], %10 {strides = array<i32>} : memref<512x50xf32, #tpu.memory_space<vmem>>, vector<256x50xf32>,
    %c0_5 = arith.constant 0 : index
    %c256 = arith.constant 256 : index
    %12 = vector.load %arg1[%c0_5, %c256] : memref<1x512xf32, #tpu.memory_space<vmem>>, vector<1x256xf32>
    %13 = vector.broadcast %12 : vector<1x256xf32> to vector<56x256xf32>
    %14 = vector.broadcast %0 : vector<56x1xf32> to vector<56x256xf32>
    %15 = arith.subf %13, %14 : vector<56x256xf32>
    %16 = arith.mulf %15, %15 : vector<56x256xf32>
    %cst_6 = arith.constant -48.0199966 : f32
    %17 = vector.broadcast %cst_6 : f32 to vector<56x256xf32>
    %18 = arith.mulf %17, %16 : vector<56x256xf32>
    %19 = math.exp %18 : vector<56x256xf32>
    %20 = tpu.transpose %19, [1, 0] : vector<56x256xf32> -> vector<256x56xf32>
    %21 = vector.extract_strided_slice %20 {offsets = [0, 0], sizes = [256, 50], strides = [1, 1]} : vector<256x56xf32> to vector<256x50xf32>
    %c256_7 = arith.constant 256 : index
    %c0_8 = arith.constant 0 : index
    %22 = vector.load %arg3[%c256_7, %c0_8] : memref<512x50xf32, #tpu.memory_space<vmem>>, vector<256x50xf32>
    tpu.vector_store %arg3[%c256_7, %c0_8], %21 {strides = array<i32>} : memref<512x50xf32, #tpu.memory_space<vmem>>, vector<256x50xf32>,
    return
  }
  func.func @transform_0(%arg0: i32) -> (i32, i32) {
    %c0_i32 = arith.constant 0 : i32
    %c0_i32_0 = arith.constant 0 : i32
    return %c0_i32, %arg0 : i32, i32
  }
  func.func @transform_1(%arg0: i32) -> (i32, i32) {
    %c0_i32 = arith.constant 0 : i32
    %c0_i32_0 = arith.constant 0 : i32
    %c0_i32_1 = arith.constant 0 : i32
    return %c0_i32, %c0_i32_0 : i32, i32
  }
  func.func @transform_2(%arg0: i32) -> (i32, i32) {
    %c0_i32 = arith.constant 0 : i32
    %c0_i32_0 = arith.constant 0 : i32
    return %arg0, %c0_i32 : i32, i32
  }
}

</mosaic_0001>

<bundles_post_ra>
// kernel: tpu_custom_call.1
= control target key start
LH: loop header
LB: loop body
LE: loop exit
PB: predicated region body
PF: predicated region fallthrough
CT: control target
= control target key end

     0   :  { %v658_v2 = vmov 0   ;;  %v20_v8 = vlaneseq  ;;  %vm199_vm0 = vcmask 408576   ;;  %s933_s0 = inlined_call_operand.vmem [shape: f32[1,300], index: 0, kind: input, shape index: {}]   ;;  %s934_s1 = inlined_call_operand.vmem [shape: f32[56,1], index: 1, kind: input, shape index: {}]   ;;  %s935_s2 = inlined_call_operand.vmem [shape: f32[300,50], index: 2, kind: output, shape index: {}]  }
   0x1   :  { %v13_v0 = vld [vmem:[%s934_s1 + $0x10] sm:$0xff]  ;;  %v11_v1 = vld [vmem:[%s934_s1] sm:$0xff]  ;;  %601 = vset.pattern.permute.xlu1 %v658_v2  ;;  %600 = vset.pattern.permute.xlu0 %v658_v2  ;;  %v14_v3 = vld [vmem:[%s934_s1 + $0x18] sm:$0xff] }
   0x2   :  { %42 = vperm.xlu1 %601, %v13_v0   ;;  %32 = vperm.xlu0 %600, %v11_v1   ;;  %v12_v4 = vld [vmem:[%s934_s1 + $0x8] sm:$0xff]  ;;  %v15_v6 = vld [vmem:[%s934_s1 + $0x20] sm:$0xff]  ;;  %v17_v7 = vld [vmem:[%s934_s1 + $0x30] sm:$0xff]  ;;  %v21_v9 = vshrl.u32 %v20_v8, 7 }
   0x3   :  { %v16_v5 = vld [vmem:[%s934_s1 + $0x28] sm:$0xff]  ;;  %v18_v12 = vld [vmem:[%s933_s0] sm:$0x3]  ;;  %v232_v13 = vld [vmem:[%s933_s0 + $0x2] sm:$0x3] }
   0x4   :  { %v22_v10 = vsub.s32 0, %v21_v9  ;;  %v26_v11 = vsub.s32 1, %v21_v9 }
   0x6   :  { %47 = vperm.xlu1 %601, %v14_v3   ;;  %37 = vperm.xlu0 %600, %v12_v4   ;;  %v701_v14 = vrot.slane %v18_v12, %v22_v10  ;;  %v703_v15 = vrot.slane %v18_v12, %v26_v11  ;;  %v705_v16 = vrot.slane %v232_v13, %v22_v10 }
   0x7   :  { %v707_v17 = vrot.slane %v232_v13, %v26_v11 }
   0xa   :  { %57 = vperm.xlu1 %601, %v16_v5   ;;  %52 = vperm.xlu0 %600, %v15_v6  }
   0xe   :  { %62 = vperm.xlu0 %600, %v17_v7  }
  0x81   :  { %v33_v18 = vpop.permute.xlu0 %32  ;;  %v717_v25 = vpop.permute.xlu1 %42 }
  0x82   :  { %v65_v19 = vsub.f32 %v701_v14, %v33_v18  ;;  %v66_v20 = vsub.f32 %v703_v15, %v33_v18  ;;  %v712_v21 = vsub.f32 %v705_v16, %v33_v18  ;;  %v715_v22 = vsub.f32 %v707_v17, %v33_v18 }
  0x83   :  { %v69_v28 = vsub.f32 %v701_v14, %v717_v25  ;;  %v70_v29 = vsub.f32 %v703_v15, %v717_v25 }
  0x84   :  { %v79_v23 = vmul.f32 %v65_v19, %v65_v19  ;;  %v80_v24 = vmul.f32 %v66_v20, %v66_v20 }
  0x85   :  { %v723_v32 = vpop.permute.xlu0 %37  ;;  %v83_v33 = vmul.f32 %v69_v28, %v69_v28  ;;  %v84_v34 = vmul.f32 %v70_v29, %v70_v29  ;;  %v725_v35 = vpop.permute.xlu1 %47 }
  0x86   :  { %v93_v26 = vmul.f32 -48.019997, %v79_v23  ;;  %v94_v27 = vmul.f32 -48.019997, %v80_v24  ;;  %v71_v36 = vsub.f32 %v701_v14, %v725_v35  ;;  %v67_v37 = vsub.f32 %v701_v14, %v723_v32 }
  0x87   :  { %v68_v38 = vsub.f32 %v703_v15, %v723_v32  ;;  %v72_v39 = vsub.f32 %v703_v15, %v725_v35  ;;  %v97_v40 = vmul.f32 -48.019997, %v83_v33  ;;  %v98_v43 = vmul.f32 -48.019997, %v84_v34 }
  0x88   :  { %v107_v30 = vmul.f32 1.442695, %v93_v26  ;;  %v109_v31 = vmul.f32 1.442695, %v94_v27  ;;  %v81_v41 = vmul.f32 %v67_v37, %v67_v37  ;;  %v85_v44 = vmul.f32 %v71_v36, %v71_v36 }
  0x89   :  { %v82_v42 = vmul.f32 %v68_v38, %v68_v38  ;;  %v735_v47 = vpop.permute.xlu0 %52  ;;  %v86_v48 = vmul.f32 %v72_v39, %v72_v39  ;;  %v737_v49 = vpop.permute.xlu1 %57  ;;  %v115_v50 = vmul.f32 1.442695, %v97_v40  ;;  %v117_v53 = vmul.f32 1.442695, %v98_v43 }
  0x8a   :  { %602 = vpow2.f32 %v107_v30  ;;  %v95_v45 = vmul.f32 -48.019997, %v81_v41  ;;  %v99_v54 = vmul.f32 -48.019997, %v85_v44  ;;  %v75_v55 = vsub.f32 %v701_v14, %v737_v49 }
  0x8b   :  { %604 = vpow2.f32 %v109_v31  ;;  %v96_v46 = vmul.f32 -48.019997, %v82_v42  ;;  %v73_v56 = vsub.f32 %v701_v14, %v735_v47  ;;  %v100_v57 = vmul.f32 -48.019997, %v86_v48 }
  0x8c   :  { %v111_v51 = vmul.f32 1.442695, %v95_v45  ;;  %v76_v58 = vsub.f32 %v703_v15, %v737_v49  ;;  %v74_v59 = vsub.f32 %v703_v15, %v735_v47  ;;  %v119_v1 = vmul.f32 1.442695, %v99_v54 }
  0x8d   :  { %v113_v52 = vmul.f32 1.442695, %v96_v46  ;;  %v87_v61 = vmul.f32 %v73_v56, %v73_v56  ;;  %v747_v62 = vpop.permute.xlu0 %62  ;;  %v89_v2 = vmul.f32 %v75_v55, %v75_v55  ;;  %v121_v4 = vmul.f32 1.442695, %v100_v57 }
  0x8e   :  { %606 = vpow2.f32 %v111_v51  ;;  %v88_v0 = vmul.f32 %v74_v59, %v74_v59  ;;  %v90_v5 = vmul.f32 %v76_v58, %v76_v58  ;;  %v77_v7 = vsub.f32 %v701_v14, %v747_v62 }
  0x8f   :  { %608 = vpow2.f32 %v113_v52  ;;  %v101_v3 = vmul.f32 -48.019997, %v87_v61  ;;  %v78_v8 = vsub.f32 %v703_v15, %v747_v62  ;;  %v103_v9 = vmul.f32 -48.019997, %v89_v2 }
  0x90   :  { %610 = vpow2.f32 %v115_v50  ;;  %v102_v6 = vmul.f32 -48.019997, %v88_v0  ;;  %v91_v11 = vmul.f32 %v77_v7, %v77_v7  ;;  %v104_v12 = vmul.f32 -48.019997, %v90_v5 }
  0x91   :  { %612 = vpow2.f32 %v117_v53  ;;  %v123_v10 = vmul.f32 1.442695, %v101_v3  ;;  %v92_v18 = vmul.f32 %v78_v8, %v78_v8  ;;  %v127_v24 = vmul.f32 1.442695, %v103_v9 }
  0x92   :  { %614 = vpow2.f32 %v119_v1  ;;  %v125_v13 = vmul.f32 1.442695, %v102_v6  ;;  %v105_v26 = vmul.f32 -48.019997, %v91_v11  ;;  %v129_v27 = vmul.f32 1.442695, %v104_v12 }
  0x93   :  { %616 = vpow2.f32 %v121_v4  ;;  %v106_v15 = vmul.f32 -48.019997, %v92_v18  ;;  %v259_v40 = vmul.f32 %v715_v22, %v715_v22  ;;  %v247_v41 = vsub.f32 %v707_v17, %v723_v32 }
  0x94   :  { %v603_v60 = vpop.eup %602  ;;  %618 = vpow2.f32 %v123_v10  ;;  %v131_v28 = vmul.f32 1.442695, %v105_v26  ;;  %v258_v42 = vmul.f32 %v712_v21, %v712_v21  ;;  %v246_v43 = vsub.f32 %v705_v16, %v723_v32 }
  0x95   :  { %v605_v63 = vpop.eup %604  ;;  %135 = vxpose.xlu1.b32.start [1/7] (short) %v603_v60, 128  ;;  %620 = vpow2.f32 %v125_v13  ;;  %v133_v29 = vmul.f32 1.442695, %v106_v15  ;;  %v248_v44 = vsub.f32 %v705_v16, %v717_v25  ;;  %v249_v45 = vsub.f32 %v707_v17, %v717_v25 }
  0x96   :  { %167 = vxpose.xlu0.b32.start [1/7] (short) %v605_v63, 128  ;;  %622 = vpow2.f32 %v127_v24  ;;  %v273_v46 = vmul.f32 -48.019997, %v259_v40  ;;  %v261_v48 = vmul.f32 %v247_v41, %v247_v41  ;;  %v272_v50 = vmul.f32 -48.019997, %v258_v42 }
  0x97   :  { %624 = vpow2.f32 %v129_v27  ;;  %v260_v51 = vmul.f32 %v246_v43, %v246_v43  ;;  %v262_v22 = vmul.f32 %v248_v44, %v248_v44  ;;  %v263_v52 = vmul.f32 %v249_v45, %v249_v45 }
  0x98   :  { %v607_v19 = vpop.eup %606  ;;  %626 = vpow2.f32 %v131_v28  ;;  %v288_v53 = vmul.f32 1.442695, %v273_v46  ;;  %v251_v54 = vsub.f32 %v707_v17, %v725_v35  ;;  %v275_v21 = vmul.f32 -48.019997, %v261_v48 }
  0x99   :  { %v609_v20 = vpop.eup %608  ;;  %136 = vxpose.xlu1.b32.cont [2/7] (short) %v607_v19, 128  ;;  %628 = vpow2.f32 %v133_v29  ;;  %v286_v55 = vmul.f32 1.442695, %v272_v50  ;;  %v250_v32 = vsub.f32 %v705_v16, %v725_v35  ;;  %v274_v56 = vmul.f32 -48.019997, %v260_v51 }
  0x9a   :  { %v611_v23 = vpop.eup %610  ;;  %168 = vxpose.xlu0.b32.cont [2/7] (short) %v609_v20, 128  ;;  %v276_v57 = vmul.f32 -48.019997, %v262_v22  ;;  %v277_v58 = vmul.f32 -48.019997, %v263_v52  ;;  %630 = vpow2.f32 %v288_v53  ;;  %v265_v25 = vmul.f32 %v251_v54, %v251_v54 }
  0x9b   :  { %v613_v14 = vpop.eup %612  ;;  %v292_v59 = vmul.f32 1.442695, %v275_v21  ;;  %v253_v60 = vsub.f32 %v707_v17, %v735_v47  ;;  %632 = vpow2.f32 %v286_v55  ;;  %v264_v61 = vmul.f32 %v250_v32, %v250_v32 }
  0x9c   :  { %v615_v30 = vpop.eup %614  ;;  %v290_v63 = vmul.f32 1.442695, %v274_v56  ;;  %v252_v0 = vsub.f32 %v705_v16, %v735_v47  ;;  %v294_v1 = vmul.f32 1.442695, %v276_v57  ;;  %v296_v2 = vmul.f32 1.442695, %v277_v58 }
  0x9d   :  { %137 = vxpose.xlu1.b32.cont [3/7] (short) %v611_v23, 128  ;;  %v617_v31 = vpop.eup %616  ;;  %v279_v3 = vmul.f32 -48.019997, %v265_v25  ;;  %634 = vpow2.f32 %v292_v59  ;;  %v255_v35 = vsub.f32 %v707_v17, %v737_v49  ;;  %v267_v4 = vmul.f32 %v253_v60, %v253_v60 }
  0x9e   :  { %169 = vxpose.xlu0.b32.cont [3/7] (short) %v613_v14, 128  ;;  %v619_v33 = vpop.eup %618  ;;  %v278_v5 = vmul.f32 -48.019997, %v264_v61  ;;  %636 = vpow2.f32 %v290_v63  ;;  %v254_v6 = vsub.f32 %v705_v16, %v737_v49  ;;  %v266_v7 = vmul.f32 %v252_v0, %v252_v0 }
  0x9f   :  { %v621_v34 = vpop.eup %620  ;;  %638 = vpow2.f32 %v294_v1  ;;  %v300_v8 = vmul.f32 1.442695, %v279_v3  ;;  %v269_v9 = vmul.f32 %v255_v35, %v255_v35  ;;  %v281_v10 = vmul.f32 -48.019997, %v267_v4 }
  0xa0   :  { %v623_v36 = vpop.eup %622  ;;  %640 = vpow2.f32 %v296_v2  ;;  %v257_v47 = vsub.f32 %v707_v17, %v747_v62  ;;  %v298_v11 = vmul.f32 1.442695, %v278_v5  ;;  %v268_v12 = vmul.f32 %v254_v6, %v254_v6 }
  0xa1   :  { %138 = vxpose.xlu1.b32.cont [4/7] (short) %v615_v30, 128  ;;  %v625_v37 = vpop.eup %624  ;;  %v280_v13 = vmul.f32 -48.019997, %v266_v7  ;;  %v256_v18 = vsub.f32 %v705_v16, %v747_v62  ;;  %642 = vpow2.f32 %v300_v8  ;;  %v283_v49 = vmul.f32 -48.019997, %v269_v9 }
  0xa2   :  { %170 = vxpose.xlu0.b32.cont [4/7] (short) %v617_v31, 128  ;;  %v627_v38 = vpop.eup %626  ;;  %v304_v23 = vmul.f32 1.442695, %v281_v10  ;;  %v271_v24 = vmul.f32 %v257_v47, %v257_v47  ;;  %644 = vpow2.f32 %v298_v11  ;;  %v282_v26 = vmul.f32 -48.019997, %v268_v12 }
  0xa3   :  { %v629_v39 = vpop.eup %628  ;;  %v302_v14 = vmul.f32 1.442695, %v280_v13  ;;  %v270_v27 = vmul.f32 %v256_v18, %v256_v18  ;;  %v308_v29 = vmul.f32 1.442695, %v283_v49 }
  0xa4   :  { %v631_v19 = vpop.eup %630  ;;  %646 = vpow2.f32 %v304_v23  ;;  %v285_v30 = vmul.f32 -48.019997, %v271_v24  ;;  %v306_v62 = vmul.f32 1.442695, %v282_v26 }
  0xa5   :  { %139 = vxpose.xlu1.b32.cont [5/7] (short) %v619_v33, 128  ;;  %v633_v20 = vpop.eup %632  ;;  %648 = vpow2.f32 %v302_v14  ;;  %v284_v31 = vmul.f32 -48.019997, %v270_v27 }
  0xa6   :  { %171 = vxpose.xlu0.b32.cont [5/7] (short) %v621_v34, 128  ;;  %650 = vpow2.f32 %v308_v29  ;;  %v312_v33 = vmul.f32 1.442695, %v285_v30 }
  0xa7   :  { %v635_v15 = vpop.eup %634  ;;  %652 = vpow2.f32 %v306_v62  ;;  %v310_v34 = vmul.f32 1.442695, %v284_v31 }
  0xa8   :  { %v637_v17 = vpop.eup %636  ;;  %654 = vpow2.f32 %v312_v33 }
  0xa9   :  { %140 = vxpose.xlu1.b32.cont [6/7] (short) %v623_v36, 128  ;;  %v639_v28 = vpop.eup %638  ;;  %656 = vpow2.f32 %v310_v34 }
  0xaa   :  { %172 = vxpose.xlu0.b32.cont [6/7] (short) %v625_v37, 128  ;;  %v641_v16 = vpop.eup %640 }
  0xab   :  { %v643_v36 = vpop.eup %642 }
  0xac   :  { %v645_v37 = vpop.eup %644 }
  0xad   :  { %141 = vxpose.xlu1.b32.end [7/7] (short) %v627_v38, 128 }
  0xae   :  { %173 = vxpose.xlu0.b32.end [7/7] (short) %v629_v39, 128  ;;  %v647_v38 = vpop.eup %646 }
  0xaf   :  { %v649_v39 = vpop.eup %648 }
  0xb0   :  { %v651_v40 = vpop.eup %650 }
  0xb1   :  { %v653_v41 = vpop.eup %652 }
  0xb2   :  { %v655_v42 = vpop.eup %654 }
  0xb3   :  { %v657_v43 = vpop.eup %656 }
  0xd2   :  { %346 = vxpose.xlu1.b32.start [1/7] (short) %v631_v19, 128 }
  0xd3   :  { %314 = vxpose.xlu0.b32.start [1/7] (short) %v633_v20, 128 }
  0xd6   :  { %347 = vxpose.xlu1.b32.cont [2/7] (short) %v635_v15, 128 }
  0xd7   :  { %315 = vxpose.xlu0.b32.cont [2/7] (short) %v637_v17, 128 }
  0xda   :  { %348 = vxpose.xlu1.b32.cont [3/7] (short) %v641_v16, 128 }
  0xdb   :  { %316 = vxpose.xlu0.b32.cont [3/7] (short) %v639_v28, 128 }
  0xde   :  { %349 = vxpose.xlu1.b32.cont [4/7] (short) %v643_v36, 128 }
  0xdf   :  { %317 = vxpose.xlu0.b32.cont [4/7] (short) %v645_v37, 128 }
  0xe2   :  { %350 = vxpose.xlu1.b32.cont [5/7] (short) %v647_v38, 128 }
  0xe3   :  { %318 = vxpose.xlu0.b32.cont [5/7] (short) %v649_v39, 128 }
  0xe6   :  { %351 = vxpose.xlu1.b32.cont [6/7] (short) %v651_v40, 128 }
  0xe7   :  { %319 = vxpose.xlu0.b32.cont [6/7] (short) %v653_v41, 128 }
  0xea   :  { %352 = vxpose.xlu1.b32.end [7/7] (short) %v655_v42, 128 }
  0xeb   :  { %320 = vxpose.xlu0.b32.end [7/7] (short) %v657_v43, 128 }
 0x115   :  { %v151_v44 = vpop.trf.xlu1 }
 0x116   :  { %v183_v45 = vpop.trf.xlu0  ;;  %200 = vst.msk [vmem:[#allocation2] sm:$0xff] %vm199_vm0, %v151_v44 }
 0x117   :  { %216 = vst.msk [vmem:[#allocation2 + $0x80] sm:$0xff] %vm199_vm0, %v183_v45 }
 0x119   :  { %v152_v46 = vpop.trf.xlu1 }
 0x11a   :  { %v184_v48 = vpop.trf.xlu0  ;;  %201 = vst.msk [vmem:[#allocation2 + $0x8] sm:$0xff] %vm199_vm0, %v152_v46 }
 0x11b   :  { %217 = vst.msk [vmem:[#allocation2 + $0x88] sm:$0xff] %vm199_vm0, %v184_v48 }
 0x11d   :  { %v513_v50 = vld [vmem:[#allocation2] sm:$0xff]  ;;  %v153_v51 = vpop.trf.xlu1 }
 0x11e   :  { %v545_v22 = vld [vmem:[#allocation2 + $0x80] sm:$0xff]  ;;  %514 = vst [vmem:[%s935_s2] sm:$0xff] %v513_v50  ;;  %v185_v52 = vpop.trf.xlu0  ;;  %202 = vst.msk [vmem:[#allocation2 + $0x10] sm:$0xff] %vm199_vm0, %v153_v51 }
 0x11f   :  { %546 = vst [vmem:[%s935_s2 + $0x80] sm:$0xff] %v545_v22  ;;  %218 = vst.msk [vmem:[#allocation2 + $0x90] sm:$0xff] %vm199_vm0, %v185_v52 }
 0x121   :  { %v515_v53 = vld [vmem:[#allocation2 + $0x8] sm:$0xff]  ;;  %v154_v54 = vpop.trf.xlu1 }
 0x122   :  { %v547_v21 = vld [vmem:[#allocation2 + $0x88] sm:$0xff]  ;;  %516 = vst [vmem:[%s935_s2 + $0x8] sm:$0xff] %v515_v53  ;;  %v186_v55 = vpop.trf.xlu0  ;;  %203 = vst.msk [vmem:[#allocation2 + $0x18] sm:$0xff] %vm199_vm0, %v154_v54 }
 0x123   :  { %548 = vst [vmem:[%s935_s2 + $0x88] sm:$0xff] %v547_v21  ;;  %219 = vst.msk [vmem:[#allocation2 + $0x98] sm:$0xff] %vm199_vm0, %v186_v55 }
 0x125   :  { %v517_v32 = vld [vmem:[#allocation2 + $0x10] sm:$0xff]  ;;  %v155_v56 = vpop.trf.xlu1 }
 0x126   :  { %v549_v57 = vld [vmem:[#allocation2 + $0x90] sm:$0xff]  ;;  %518 = vst [vmem:[%s935_s2 + $0x10] sm:$0xff] %v517_v32  ;;  %v187_v58 = vpop.trf.xlu0  ;;  %204 = vst.msk [vmem:[#allocation2 + $0x20] sm:$0xff] %vm199_vm0, %v155_v56 }
 0x127   :  { %550 = vst [vmem:[%s935_s2 + $0x90] sm:$0xff] %v549_v57  ;;  %220 = vst.msk [vmem:[#allocation2 + $0xa0] sm:$0xff] %vm199_vm0, %v187_v58 }
 0x129   :  { %v519_v25 = vld [vmem:[#allocation2 + $0x18] sm:$0xff]  ;;  %v156_v59 = vpop.trf.xlu1 }
 0x12a   :  { %v551_v60 = vld [vmem:[#allocation2 + $0x98] sm:$0xff]  ;;  %520 = vst [vmem:[%s935_s2 + $0x18] sm:$0xff] %v519_v25  ;;  %v188_v61 = vpop.trf.xlu0  ;;  %205 = vst.msk [vmem:[#allocation2 + $0x28] sm:$0xff] %vm199_vm0, %v156_v59 }
 0x12b   :  { %552 = vst [vmem:[%s935_s2 + $0x98] sm:$0xff] %v551_v60  ;;  %221 = vst.msk [vmem:[#allocation2 + $0xa8] sm:$0xff] %vm199_vm0, %v188_v61 }
 0x12d   :  { %v521_v63 = vld [vmem:[#allocation2 + $0x20] sm:$0xff]  ;;  %v157_v0 = vpop.trf.xlu1 }
 0x12e   :  { %v553_v1 = vld [vmem:[#allocation2 + $0xa0] sm:$0xff]  ;;  %522 = vst [vmem:[%s935_s2 + $0x20] sm:$0xff] %v521_v63  ;;  %v189_v2 = vpop.trf.xlu0  ;;  %206 = vst.msk [vmem:[#allocation2 + $0x30] sm:$0xff] %vm199_vm0, %v157_v0 }
 0x12f   :  { %554 = vst [vmem:[%s935_s2 + $0xa0] sm:$0xff] %v553_v1  ;;  %222 = vst.msk [vmem:[#allocation2 + $0xb0] sm:$0xff] %vm199_vm0, %v189_v2 }
 0x131   :  { %v523_v3 = vld [vmem:[#allocation2 + $0x28] sm:$0xff]  ;;  %v158_v35 = vpop.trf.xlu1 }
 0x132   :  { %v555_v4 = vld [vmem:[#allocation2 + $0xa8] sm:$0xff]  ;;  %524 = vst [vmem:[%s935_s2 + $0x28] sm:$0xff] %v523_v3  ;;  %v190_v5 = vpop.trf.xlu0  ;;  %207 = vst.msk [vmem:[#allocation2 + $0x38] sm:$0xff] %vm199_vm0, %v158_v35 }
 0x133   :  { %556 = vst [vmem:[%s935_s2 + $0xa8] sm:$0xff] %v555_v4  ;;  %223 = vst.msk [vmem:[#allocation2 + $0xb8] sm:$0xff] %vm199_vm0, %v190_v5 }
 0x135   :  { %v525_v6 = vld [vmem:[#allocation2 + $0x30] sm:$0xff]  ;;  %v159_v7 = vpop.trf.xlu1 }
 0x136   :  { %v557_v8 = vld [vmem:[#allocation2 + $0xb0] sm:$0xff]  ;;  %526 = vst [vmem:[%s935_s2 + $0x30] sm:$0xff] %v525_v6  ;;  %v191_v9 = vpop.trf.xlu0  ;;  %208 = vst.msk [vmem:[#allocation2 + $0x40] sm:$0xff] %vm199_vm0, %v159_v7 }
 0x137   :  { %558 = vst [vmem:[%s935_s2 + $0xb0] sm:$0xff] %v557_v8  ;;  %224 = vst.msk [vmem:[#allocation2 + $0xc0] sm:$0xff] %vm199_vm0, %v191_v9 }
 0x139   :  { %v527_v10 = vld [vmem:[#allocation2 + $0x38] sm:$0xff]  ;;  %v160_v47 = vpop.trf.xlu1 }
 0x13a   :  { %v559_v11 = vld [vmem:[#allocation2 + $0xb8] sm:$0xff]  ;;  %528 = vst [vmem:[%s935_s2 + $0x38] sm:$0xff] %v527_v10  ;;  %v192_v12 = vpop.trf.xlu0  ;;  %209 = vst.msk [vmem:[#allocation2 + $0x48] sm:$0xff] %vm199_vm0, %v160_v47 }
 0x13b   :  { %560 = vst [vmem:[%s935_s2 + $0xb8] sm:$0xff] %v559_v11  ;;  %225 = vst.msk [vmem:[#allocation2 + $0xc8] sm:$0xff] %vm199_vm0, %v192_v12 }
 0x13d   :  { %v529_v13 = vld [vmem:[#allocation2 + $0x40] sm:$0xff]  ;;  %v161_v18 = vpop.trf.xlu1 }
 0x13e   :  { %v561_v19 = vld [vmem:[#allocation2 + $0xc0] sm:$0xff]  ;;  %530 = vst [vmem:[%s935_s2 + $0x40] sm:$0xff] %v529_v13  ;;  %v193_v20 = vpop.trf.xlu0  ;;  %210 = vst.msk [vmem:[#allocation2 + $0x50] sm:$0xff] %vm199_vm0, %v161_v18 }
 0x13f   :  { %562 = vst [vmem:[%s935_s2 + $0xc0] sm:$0xff] %v561_v19  ;;  %226 = vst.msk [vmem:[#allocation2 + $0xd0] sm:$0xff] %vm199_vm0, %v193_v20 }
 0x141   :  { %v531_v49 = vld [vmem:[#allocation2 + $0x48] sm:$0xff]  ;;  %v162_v23 = vpop.trf.xlu1 }
 0x142   :  { %v563_v24 = vld [vmem:[#allocation2 + $0xc8] sm:$0xff]  ;;  %532 = vst [vmem:[%s935_s2 + $0x48] sm:$0xff] %v531_v49  ;;  %v194_v26 = vpop.trf.xlu0  ;;  %211 = vst.msk [vmem:[#allocation2 + $0x58] sm:$0xff] %vm199_vm0, %v162_v23 }
 0x143   :  { %564 = vst [vmem:[%s935_s2 + $0xc8] sm:$0xff] %v563_v24  ;;  %227 = vst.msk [vmem:[#allocation2 + $0xd8] sm:$0xff] %vm199_vm0, %v194_v26 }
 0x145   :  { %v533_v14 = vld [vmem:[#allocation2 + $0x50] sm:$0xff]  ;;  %v163_v27 = vpop.trf.xlu1 }
 0x146   :  { %v565_v15 = vld [vmem:[#allocation2 + $0xd0] sm:$0xff]  ;;  %534 = vst [vmem:[%s935_s2 + $0x50] sm:$0xff] %v533_v14  ;;  %v195_v17 = vpop.trf.xlu0  ;;  %212 = vst.msk [vmem:[#allocation2 + $0x60] sm:$0xff] %vm199_vm0, %v163_v27 }
 0x147   :  { %566 = vst [vmem:[%s935_s2 + $0xd0] sm:$0xff] %v565_v15  ;;  %228 = vst.msk [vmem:[#allocation2 + $0xe0] sm:$0xff] %vm199_vm0, %v195_v17 }
 0x149   :  { %v535_v28 = vld [vmem:[#allocation2 + $0x58] sm:$0xff]  ;;  %v164_v29 = vpop.trf.xlu1 }
 0x14a   :  { %v567_v30 = vld [vmem:[#allocation2 + $0xd8] sm:$0xff]  ;;  %536 = vst [vmem:[%s935_s2 + $0x58] sm:$0xff] %v535_v28  ;;  %v196_v16 = vpop.trf.xlu0  ;;  %213 = vst.msk [vmem:[#allocation2 + $0x68] sm:$0xff] %vm199_vm0, %v164_v29 }
 0x14b   :  { %568 = vst [vmem:[%s935_s2 + $0xd8] sm:$0xff] %v567_v30  ;;  %229 = vst.msk [vmem:[#allocation2 + $0xe8] sm:$0xff] %vm199_vm0, %v196_v16 }
 0x14d   :  { %v537_v62 = vld [vmem:[#allocation2 + $0x60] sm:$0xff]  ;;  %v165_v31 = vpop.trf.xlu1 }
 0x14e   :  { %v569_v33 = vld [vmem:[#allocation2 + $0xe0] sm:$0xff]  ;;  %538 = vst [vmem:[%s935_s2 + $0x60] sm:$0xff] %v537_v62  ;;  %v197_v34 = vpop.trf.xlu0  ;;  %214 = vst.msk [vmem:[#allocation2 + $0x70] sm:$0xff] %vm199_vm0, %v165_v31 }
 0x14f   :  { %570 = vst [vmem:[%s935_s2 + $0xe0] sm:$0xff] %v569_v33  ;;  %230 = vst.msk [vmem:[#allocation2 + $0xf0] sm:$0xff] %vm199_vm0, %v197_v34 }
 0x151   :  { %v539_v36 = vld [vmem:[#allocation2 + $0x68] sm:$0xff]  ;;  %v166_v37 = vpop.trf.xlu1 }
 0x152   :  { %v571_v38 = vld [vmem:[#allocation2 + $0xe8] sm:$0xff]  ;;  %540 = vst [vmem:[%s935_s2 + $0x68] sm:$0xff] %v539_v36  ;;  %v198_v39 = vpop.trf.xlu0  ;;  %215 = vst.msk [vmem:[#allocation2 + $0x78] sm:$0xff] %vm199_vm0, %v166_v37 }
 0x153   :  { %572 = vst [vmem:[%s935_s2 + $0xe8] sm:$0xff] %v571_v38  ;;  %231 = vst.msk [vmem:[#allocation2 + $0xf8] sm:$0xff] %vm199_vm0, %v198_v39 }
 0x155   :  { %v541_v40 = vld [vmem:[#allocation2 + $0x70] sm:$0xff]  ;;  %v362_v41 = vpop.trf.xlu1 }
 0x156   :  { %v573_v42 = vld [vmem:[#allocation2 + $0xf0] sm:$0xff]  ;;  %542 = vst [vmem:[%s935_s2 + $0x70] sm:$0xff] %v541_v40  ;;  %v330_v43 = vpop.trf.xlu0 }
 0x157   :  { %574 = vst [vmem:[%s935_s2 + $0xf0] sm:$0xff] %v573_v42  ;;  %378 = vst.msk [vmem:[#allocation2 + $0x100] sm:$0xff] %vm199_vm0, %v330_v43 }
 0x159   :  { %v543_v44 = vld [vmem:[#allocation2 + $0x78] sm:$0xff]  ;;  %v363_v45 = vpop.trf.xlu1 }
 0x15a   :  { %v575_v46 = vld [vmem:[#allocation2 + $0xf8] sm:$0xff]  ;;  %544 = vst [vmem:[%s935_s2 + $0x78] sm:$0xff] %v543_v44  ;;  %v331_v48 = vpop.trf.xlu0 }
 0x15b   :  { %576 = vst [vmem:[%s935_s2 + $0xf8] sm:$0xff] %v575_v46  ;;  %379 = vst.msk [vmem:[#allocation2 + $0x108] sm:$0xff] %vm199_vm0, %v331_v48 }
 0x15d   :  { %v364_v50 = vpop.trf.xlu1 }
 0x15e   :  { %v577_v51 = vld [vmem:[#allocation2 + $0x100] sm:$0xff]  ;;  %v332_v22 = vpop.trf.xlu0 }
 0x15f   :  { %578 = vst [vmem:[%s935_s2 + $0x100] sm:$0xff] %v577_v51  ;;  %380 = vst.msk [vmem:[#allocation2 + $0x110] sm:$0xff] %vm199_vm0, %v332_v22 }
 0x161   :  { %v365_v52 = vpop.trf.xlu1 }
 0x162   :  { %v579_v53 = vld [vmem:[#allocation2 + $0x108] sm:$0xff]  ;;  %v333_v54 = vpop.trf.xlu0 }
 0x163   :  { %580 = vst [vmem:[%s935_s2 + $0x108] sm:$0xff] %v579_v53  ;;  %381 = vst.msk [vmem:[#allocation2 + $0x118] sm:$0xff] %vm199_vm0, %v333_v54 }
 0x165   :  { %v366_v21 = vpop.trf.xlu1 }
 0x166   :  { %v581_v55 = vld [vmem:[#allocation2 + $0x110] sm:$0xff]  ;;  %v334_v32 = vpop.trf.xlu0 }
 0x167   :  { %582 = vst [vmem:[%s935_s2 + $0x110] sm:$0xff] %v581_v55  ;;  %382 = vst.msk [vmem:[#allocation2 + $0x120] sm:$0xff] %vm199_vm0, %v334_v32 }
 0x169   :  { %v367_v56 = vpop.trf.xlu1 }
 0x16a   :  { %v583_v57 = vld [vmem:[#allocation2 + $0x118] sm:$0xff]  ;;  %v335_v58 = vpop.trf.xlu0 }
 0x16b   :  { %584 = vst [vmem:[%s935_s2 + $0x118] sm:$0xff] %v583_v57  ;;  %383 = vst.msk [vmem:[#allocation2 + $0x128] sm:$0xff] %vm199_vm0, %v335_v58 }
 0x16d   :  { %v368_v25 = vpop.trf.xlu1 }
 0x16e   :  { %v585_v59 = vld [vmem:[#allocation2 + $0x120] sm:$0xff]  ;;  %v336_v60 = vpop.trf.xlu0 }
 0x16f   :  { %586 = vst [vmem:[%s935_s2 + $0x120] sm:$0xff] %v585_v59 }
 0x171   :  { %v369_v61 = vpop.trf.xlu1 }
 0x172   :  { %v587_v63 = vld [vmem:[#allocation2 + $0x128] sm:$0xff]  ;;  %v337_v0 = vpop.trf.xlu0 }
 0x173   :  { %588 = vst [vmem:[%s935_s2 + $0x128] sm:$0xff] %v587_v63 }
 0x175   :  { %v370_v1 = vpop.trf.xlu1 }
 0x176   :  { %v338_v2 = vpop.trf.xlu0 }
 0x179   :  { %v371_v3 = vpop.trf.xlu1 }
 0x17a   :  { %v339_v35 = vpop.trf.xlu0 }
 0x17d   :  { %v372_v4 = vpop.trf.xlu1 }
 0x17e   :  { %v340_v5 = vpop.trf.xlu0 }
 0x181   :  { %v373_v6 = vpop.trf.xlu1 }
 0x182   :  { %v341_v7 = vpop.trf.xlu0 }
 0x185   :  { %v374_v8 = vpop.trf.xlu1 }
 0x186   :  { %v342_v9 = vpop.trf.xlu0 }
 0x189   :  { %v375_v10 = vpop.trf.xlu1 }
 0x18a   :  { %v343_v47 = vpop.trf.xlu0 }
 0x18d   :  { %v376_v11 = vpop.trf.xlu1 }
 0x18e   :  { %v344_v12 = vpop.trf.xlu0 }
 0x191   :  { %v377_v13 = vpop.trf.xlu1 }
 0x192   :  { %v345_v18 = vpop.trf.xlu0 }

</bundles_post_ra>
